<compile_context>
chip_gen: v5e
topology: v5e:2x2
jax: 0.10.0
libtpu: 0.0.40
codegen_flags: <defaults>
</compile_context>

<pallas_src>
import jax
import jax.numpy as jnp
from jax.experimental import pallas as pl
from jax.experimental.pallas import tpu as pltpu

_BN_EPS = 1e-5


def _round_up(n, m):
    return ((n + m - 1) // m) * m


# ----------------------------------------------------------------------------
# Kernel
# ----------------------------------------------------------------------------
def _mlp_kernel(x_ref,
                w1_ref, b1_ref,
                w2_ref, b2_ref,
                w3_ref, b3_ref,
                wh_ref, bh_ref,
                out_ref):
    """One batch tile of the full forward pass (bf16 MXU, f32 accumulate)."""
    # f32 -> bf16 cast folded into the kernel (VALU has large slack vs MXU).
    h = x_ref[...].astype(jnp.bfloat16)                               # (TB, d0)
    h = jnp.dot(h, w1_ref[...], preferred_element_type=jnp.float32) + b1_ref[...]
    h = jnp.maximum(h, 0.0).astype(jnp.bfloat16)                      # (TB, d1)
    h = jnp.dot(h, w2_ref[...], preferred_element_type=jnp.float32) + b2_ref[...]
    h = jnp.maximum(h, 0.0).astype(jnp.bfloat16)                      # (TB, d2)
    h = jnp.dot(h, w3_ref[...], preferred_element_type=jnp.float32) + b3_ref[...]
    h = jnp.maximum(h, 0.0)                                           # (TB, d3) f32

    # Fused 64->2 heads on VPU/XLU instead of the MXU: per-head broadcast
    # multiply + lane reduction.  wh_ref is (2, d3) f32 (row 0 = severity,
    # row 1 = solved), so wh[0:1, :] sublane-broadcasts cleanly over h.
    wh = wh_ref[...]                                                  # (2, d3)
    sev = jnp.sum(h * wh[0:1, :], axis=-1, keepdims=True)             # (TB, 1)
    sol = jnp.sum(h * wh[1:2, :], axis=-1, keepdims=True)             # (TB, 1)
    col = jax.lax.broadcasted_iota(jnp.int32, out_ref.shape, dimension=1)
    out_ref[...] = jnp.where(col == 0, sev, sol) + bh_ref[...]        # (TB, 2)


# ----------------------------------------------------------------------------
# Tiling heuristic
# ----------------------------------------------------------------------------
def _choose_tiling(batch, *, max_tile=2048, granule=16, min_steps=2):
    """Pick (tile_b, padded_batch).

    granule=16 is the bf16 sublane minimum (no 256-multiple requirement).
    min_steps=2 keeps both v7x TensorCores busy via the 'parallel' grid axis
    whenever the batch is large enough to split.
    """
    b_pad = _round_up(batch, granule)
    if b_pad <= granule:                       # tiny / latency case: one minimal tile
        return b_pad, b_pad
    n_steps = max(min_steps, pl.cdiv(b_pad, max_tile))
    tb = _round_up(pl.cdiv(b_pad, n_steps), granule)
    return tb, tb * n_steps


# ----------------------------------------------------------------------------
# Wrapper
# ----------------------------------------------------------------------------
def medical_classifier_forward(x, kp, *, max_tile=2048):
    """x: (B, input_dim) f32.  kp: dict of folded / packed kernel params."""
    B, d0 = x.shape
    tb, b_pad = _choose_tiling(B, max_tile=max_tile)
    if b_pad != B:
        x = jnp.pad(x, ((0, b_pad - B), (0, 0)))

    weights = (kp["w1"], kp["b1"], kp["w2"], kp["b2"],
               kp["w3"], kp["b3"], kp["wh"], kp["bh"])
    d1 = kp["w1"].shape[1]
    d2 = kp["w2"].shape[1]
    d3 = kp["w3"].shape[1]
    dout = kp["bh"].shape[1]

    weight_bytes = sum(int(w.size) * w.dtype.itemsize for w in weights)
    flops = 2 * b_pad * (d0 * d1 + d1 * d2 + d2 * d3 + d3 * dout)
    bytes_accessed = b_pad * d0 * 4 + b_pad * dout * 4 + weight_bytes

    # Right-sized VMEM budget (double-buffered I/O tiles + resident weights +
    # f32/bf16 activation temporaries), generous 2x margin, well under 64 MiB.
    x_tile_bytes = tb * d0 * 4
    out_tile_bytes = tb * dout * 4
    act_bytes = tb * (d1 + d2 + d3) * 6            # f32 accum + bf16 copy
    vmem_est = 2 * (x_tile_bytes + out_tile_bytes + weight_bytes) + act_bytes
    vmem_limit = int(min(56 * 2**20, max(8 * 2**20, 2 * vmem_est)))

    def _const_spec(a):
        return pl.BlockSpec(a.shape, lambda i: (0, 0))

    grid = (b_pad // tb,)
    out = pl.pallas_call(
        _mlp_kernel,
        out_shape=jax.ShapeDtypeStruct((b_pad, dout), jnp.float32),
        grid=grid,
        in_specs=[pl.BlockSpec((tb, d0), lambda i: (i, 0))]
                 + [_const_spec(w) for w in weights],
        out_specs=pl.BlockSpec((tb, dout), lambda i: (i, 0)),
        compiler_params=pltpu.CompilerParams(
            dimension_semantics=("parallel",),
            vmem_limit_bytes=vmem_limit),
        cost_estimate=pl.CostEstimate(flops=flops,
                                      transcendentals=0,
                                      bytes_accessed=bytes_accessed),
    )(x, *weights)
    return out[:B]


# ----------------------------------------------------------------------------
# Parameter construction (PyTorch-shaped raw params) and folding
# ----------------------------------------------------------------------------
def init_raw_params(key, input_dim, hidden_dims=(256, 128, 64)):
    """Deterministic synthetic parameters mirroring the PyTorch module.

    Linear weights are (out, in) like nn.Linear; BatchNorm has non-trivial
    gamma/beta/running stats so the weight folding is actually exercised.
    """
    dims = [input_dim] + list(hidden_dims)
    keys = jax.random.split(key, 32)
    p = {}
    k = 0
    for i in range(3):
        din, dout = dims[i], dims[i + 1]
        p[f"w{i+1}"] = jax.random.normal(keys[k], (dout, din), jnp.float32) * 0.05; k += 1
        p[f"b{i+1}"] = jax.random.normal(keys[k], (dout,), jnp.float32) * 0.05; k += 1
        p[f"gamma{i+1}"] = 1.0 + 0.2 * jax.random.normal(keys[k], (dout,), jnp.float32); k += 1
        p[f"beta{i+1}"] = 0.1 * jax.random.normal(keys[k], (dout,), jnp.float32); k += 1
        p[f"mean{i+1}"] = 0.1 * jax.random.normal(keys[k], (dout,), jnp.float32); k += 1
        p[f"var{i+1}"] = 0.5 + jax.random.uniform(keys[k], (dout,), jnp.float32); k += 1
    d_last = dims[-1]
    p["w_sev"] = jax.random.normal(keys[k], (1, d_last), jnp.float32) * 0.05; k += 1
    p["b_sev"] = jax.random.normal(keys[k], (1,), jnp.float32) * 0.05; k += 1
    p["w_sol"] = jax.random.normal(keys[k], (1, d_last), jnp.float32) * 0.05; k += 1
    p["b_sol"] = jax.random.normal(keys[k], (1,), jnp.float32) * 0.05; k += 1
    return p


def fold_and_pack_params(raw):
    """Fold eval-mode BatchNorm into the next layer's weights; pack for the kernel."""
    scale, shift = [], []
    for i in range(3):
        s = raw[f"gamma{i+1}"] / jnp.sqrt(raw[f"var{i+1}"] + _BN_EPS)
        t = raw[f"beta{i+1}"] - raw[f"mean{i+1}"] * s
        scale.append(s)
        shift.append(t)

    w1 = raw["w1"].T                                   # (d0, d1)
    b1 = raw["b1"]
    w2 = raw["w2"].T                                   # (d1, d2)
    b2 = raw["b2"]
    w3 = raw["w3"].T                                   # (d2, d3)
    b3 = raw["b3"]

    # BN1 -> layer2, BN2 -> layer3.
    w2f = scale[0][:, None] * w2
    b2f = shift[0] @ w2 + b2
    w3f = scale[1][:, None] * w3
    b3f = shift[1] @ w3 + b3

    # Heads packed as rows (2, d3) for the VPU head: row 0 = severity, 1 = solved.
    # BN3 folded in: w_row * s, bias += w_row . shift.
    wh_rows = jnp.concatenate([raw["w_sev"], raw["w_sol"]], axis=0)   # (2, d3)
    bh_rows = jnp.concatenate([raw["b_sev"], raw["b_sol"]])           # (2,)
    whf = wh_rows * scale[2][None, :]                                 # (2, d3)
    bhf = wh_rows @ shift[2] + bh_rows                                # (2,)

    kp = {
        "w1": w1.astype(jnp.bfloat16),  "b1": b1.reshape(1, -1).astype(jnp.float32),
        "w2": w2f.astype(jnp.bfloat16), "b2": b2f.reshape(1, -1).astype(jnp.float32),
        "w3": w3f.astype(jnp.bfloat16), "b3": b3f.reshape(1, -1).astype(jnp.float32),
        "wh": whf.astype(jnp.float32),  "bh": bhf.reshape(1, -1).astype(jnp.float32),
    }
    return kp


def reference_forward(x, raw):
    """Plain-JAX f32 reference with the *original* (unfolded) eval-mode math."""
    h = x
    for i in range(3):
        h = h @ raw[f"w{i+1}"].T + raw[f"b{i+1}"]
        h = jnp.maximum(h, 0.0)
        s = raw[f"gamma{i+1}"] / jnp.sqrt(raw[f"var{i+1}"] + _BN_EPS)
        h = (h - raw[f"mean{i+1}"]) * s + raw[f"beta{i+1}"]
        # Dropout(0.3) is identity in eval mode.
    sev = h @ raw["w_sev"].T + raw["b_sev"]
    sol = h @ raw["w_sol"].T + raw["b_sol"]
    return jnp.concatenate([sev, sol], axis=1)


if __name__ == "__main__":
    key = jax.random.PRNGKey(0)
    k_param, k_x = jax.random.split(key)

    batch, input_dim = 8, 32
    raw = init_raw_params(k_param, input_dim)
    kp = fold_and_pack_params(raw)
    x = jax.random.normal(k_x, (batch, input_dim), jnp.float32)

    out = medical_classifier_forward(x, kp)
    out = jax.block_until_ready(out)

    ref = reference_forward(x, raw)
    assert out.shape == (batch, 2), out.shape
    # bf16 MXU inputs (f32 accumulate) -> loosened tolerance vs the f32 reference.
    assert jnp.allclose(out, ref, atol=3e-2, rtol=3e-2), "mismatch vs reference"

    print("KERNEL_OK")
</pallas_src>

<mosaic_0001>
module attributes {stable_mosaic.version = 11 : i64} {
  func.func @_mlp_kernel(%arg0: i32, %arg1: memref<16x32xf32, #tpu.memory_space<vmem>>, %arg2: memref<32x256xbf16, #tpu.memory_space<vmem>>, %arg3: memref<1x256xf32, #tpu.memory_space<vmem>>, %arg4: memref<256x128xbf16, #tpu.memory_space<vmem>>, %arg5: memref<1x128xf32, #tpu.memory_space<vmem>>, %arg6: memref<128x64xbf16, #tpu.memory_space<vmem>>, %arg7: memref<1x64xf32, #tpu.memory_space<vmem>>, %arg8: memref<2x64xf32, #tpu.memory_space<vmem>>, %arg9: memref<1x2xf32, #tpu.memory_space<vmem>>, %arg10: memref<16x2xf32, #tpu.memory_space<vmem>>) attributes {dimension_semantics = [#tpu.dimension_semantics<parallel>], iteration_bounds = array<i64: 1>, scalar_prefetch = 0 : i64, scratch_operands = 0 : i64, tpu.core_type = #tpu.core_type<tc>, window_params = [{transform_indices = @transform_0, window_bounds = array<i64: 16, 32>}, {pipeline_mode = #tpu.pipeline_mode<synchronous>, transform_indices = @transform_1, window_bounds = array<i64: 32, 256>}, {pipeline_mode = #tpu.pipeline_mode<synchronous>, transform_indices = @transform_2, window_bounds = array<i64: 1, 256>}, {pipeline_mode = #tpu.pipeline_mode<synchronous>, transform_indices = @transform_3, window_bounds = array<i64: 256, 128>}, {pipeline_mode = #tpu.pipeline_mode<synchronous>, transform_indices = @transform_4, window_bounds = array<i64: 1, 128>}, {pipeline_mode = #tpu.pipeline_mode<synchronous>, transform_indices = @transform_5, window_bounds = array<i64: 128, 64>}, {pipeline_mode = #tpu.pipeline_mode<synchronous>, transform_indices = @transform_6, window_bounds = array<i64: 1, 64>}, {pipeline_mode = #tpu.pipeline_mode<synchronous>, transform_indices = @transform_7, window_bounds = array<i64: 2, 64>}, {pipeline_mode = #tpu.pipeline_mode<synchronous>, transform_indices = @transform_8, window_bounds = array<i64: 1, 2>}, {transform_indices = @transform_9, window_bounds = array<i64: 16, 2>}]} {
    %c0 = arith.constant 0 : index
    %c0_0 = arith.constant 0 : index
    %0 = vector.load %arg1[%c0, %c0_0] : memref<16x32xf32, #tpu.memory_space<vmem>>, vector<16x32xf32>
    %1 = arith.truncf %0 : vector<16x32xf32> to vector<16x32xbf16>
    %c0_1 = arith.constant 0 : index
    %c0_2 = arith.constant 0 : index
    %2 = vector.load %arg2[%c0_1, %c0_2] : memref<32x256xbf16, #tpu.memory_space<vmem>>, vector<32x256xbf16>
    %cst = arith.constant dense<0.000000e+00> : vector<16x256xf32>
    %3 = tpu.matmul %1, %2, %cst {dimension_numbers = #tpu.dot_dimension_numbers<[1], [0], [0], [1], [0, 0, 1, 1], [], []>} : vector<16x32xbf16>, vector<32x256xbf16>, vector<16x256xf32> -> vector<16x256xf32>
    %c0_3 = arith.constant 0 : index
    %c0_4 = arith.constant 0 : index
    %4 = vector.load %arg3[%c0_3, %c0_4] : memref<1x256xf32, #tpu.memory_space<vmem>>, vector<1x256xf32>
    %5 = vector.broadcast %4 : vector<1x256xf32> to vector<16x256xf32>
    %6 = arith.addf %3, %5 : vector<16x256xf32>
    %cst_5 = arith.constant 0.000000e+00 : f32
    %7 = vector.broadcast %cst_5 : f32 to vector<16x256xf32>
    %8 = arith.maximumf %6, %7 : vector<16x256xf32>
    %9 = arith.truncf %8 : vector<16x256xf32> to vector<16x256xbf16>
    %c0_6 = arith.constant 0 : index
    %c0_7 = arith.constant 0 : index
    %10 = vector.load %arg4[%c0_6, %c0_7] : memref<256x128xbf16, #tpu.memory_space<vmem>>, vector<256x128xbf16>
    %cst_8 = arith.constant dense<0.000000e+00> : vector<16x128xf32>
    %11 = tpu.matmul %9, %10, %cst_8 {dimension_numbers = #tpu.dot_dimension_numbers<[1], [0], [0], [1], [0, 0, 1, 1], [], []>} : vector<16x256xbf16>, vector<256x128xbf16>, vector<16x128xf32> -> vector<16x128xf32>
    %c0_9 = arith.constant 0 : index
    %c0_10 = arith.constant 0 : index
    %12 = vector.load %arg5[%c0_9, %c0_10] : memref<1x128xf32, #tpu.memory_space<vmem>>, vector<1x128xf32>
    %13 = vector.broadcast %12 : vector<1x128xf32> to vector<16x128xf32>
    %14 = arith.addf %11, %13 : vector<16x128xf32>
    %cst_11 = arith.constant 0.000000e+00 : f32
    %15 = vector.broadcast %cst_11 : f32 to vector<16x128xf32>
    %16 = arith.maximumf %14, %15 : vector<16x128xf32>
    %17 = arith.truncf %16 : vector<16x128xf32> to vector<16x128xbf16>
    %c0_12 = arith.constant 0 : index
    %c0_13 = arith.constant 0 : index
    %18 = vector.load %arg6[%c0_12, %c0_13] : memref<128x64xbf16, #tpu.memory_space<vmem>>, vector<128x64xbf16>
    %cst_14 = arith.constant dense<0.000000e+00> : vector<16x64xf32>
    %19 = tpu.matmul %17, %18, %cst_14 {dimension_numbers = #tpu.dot_dimension_numbers<[1], [0], [0], [1], [0, 0, 1, 1], [], []>} : vector<16x128xbf16>, vector<128x64xbf16>, vector<16x64xf32> -> vector<16x64xf32>
    %c0_15 = arith.constant 0 : index
    %c0_16 = arith.constant 0 : index
    %20 = vector.load %arg7[%c0_15, %c0_16] : memref<1x64xf32, #tpu.memory_space<vmem>>, vector<1x64xf32>
    %21 = vector.broadcast %20 : vector<1x64xf32> to vector<16x64xf32>
    %22 = arith.addf %19, %21 : vector<16x64xf32>
    %cst_17 = arith.constant 0.000000e+00 : f32
    %23 = vector.broadcast %cst_17 : f32 to vector<16x64xf32>
    %24 = arith.maximumf %22, %23 : vector<16x64xf32>
    %c0_18 = arith.constant 0 : index
    %c0_19 = arith.constant 0 : index
    %25 = vector.load %arg8[%c0_18, %c0_19] : memref<2x64xf32, #tpu.memory_space<vmem>>, vector<2x64xf32>
    %26 = vector.extract_strided_slice %25 {offsets = [0, 0], sizes = [1, 64], strides = [1, 1]} : vector<2x64xf32> to vector<1x64xf32>
    %27 = vector.broadcast %26 : vector<1x64xf32> to vector<16x64xf32>
    %28 = arith.mulf %24, %27 : vector<16x64xf32>
    %cst_20 = arith.constant dense<0.000000e+00> : vector<16xf32>
    %29 = vector.multi_reduction <add>, %28, %cst_20 [1] : vector<16x64xf32> to vector<16xf32>
    %30 = vector.shape_cast %29 : vector<16xf32> to vector<16x1xf32>
    %31 = vector.extract_strided_slice %25 {offsets = [1, 0], sizes = [1, 64], strides = [1, 1]} : vector<2x64xf32> to vector<1x64xf32>
    %32 = vector.broadcast %31 : vector<1x64xf32> to vector<16x64xf32>
    %33 = arith.mulf %24, %32 : vector<16x64xf32>
    %cst_21 = arith.constant dense<0.000000e+00> : vector<16xf32>
    %34 = vector.multi_reduction <add>, %33, %cst_21 [1] : vector<16x64xf32> to vector<16xf32>
    %35 = vector.shape_cast %34 : vector<16xf32> to vector<16x1xf32>
    %36 = tpu.iota {dimensions = array<i32: 1>} : vector<16x2xi32>
    %c0_i32 = arith.constant 0 : i32
    %37 = vector.broadcast %c0_i32 : i32 to vector<16x2xi32>
    %38 = arith.cmpi eq, %36, %37 : vector<16x2xi32>
    %39 = vector.shape_cast %30 : vector<16x1xf32> to vector<16x1xf32>
    %40 = vector.broadcast %39 : vector<16x1xf32> to vector<16x2xf32>
    %41 = vector.shape_cast %35 : vector<16x1xf32> to vector<16x1xf32>
    %42 = vector.broadcast %41 : vector<16x1xf32> to vector<16x2xf32>
    %43 = arith.select %38, %40, %42 : vector<16x2xi1>, vector<16x2xf32>
    %c0_22 = arith.constant 0 : index
    %c0_23 = arith.constant 0 : index
    %44 = vector.load %arg9[%c0_22, %c0_23] : memref<1x2xf32, #tpu.memory_space<vmem>>, vector<1x2xf32>
    %45 = vector.broadcast %44 : vector<1x2xf32> to vector<16x2xf32>
    %46 = arith.addf %43, %45 : vector<16x2xf32>
    %c0_24 = arith.constant 0 : index
    %c0_25 = arith.constant 0 : index
    %47 = vector.load %arg10[%c0_24, %c0_25] : memref<16x2xf32, #tpu.memory_space<vmem>>, vector<16x2xf32>
    tpu.vector_store %arg10[%c0_24, %c0_25], %46 {strides = array<i32>} : memref<16x2xf32, #tpu.memory_space<vmem>>, vector<16x2xf32>,
    return
  }
  func.func @transform_0(%arg0: i32) -> (i32, i32) {
    %c0_i32 = arith.constant 0 : i32
    %c0_i32_0 = arith.constant 0 : i32
    return %arg0, %c0_i32 : i32, i32
  }
  func.func @transform_1(%arg0: i32) -> (i32, i32) {
    %c0_i32 = arith.constant 0 : i32
    %c0_i32_0 = arith.constant 0 : i32
    %c0_i32_1 = arith.constant 0 : i32
    return %c0_i32, %c0_i32_0 : i32, i32
  }
  func.func @transform_2(%arg0: i32) -> (i32, i32) {
    %c0_i32 = arith.constant 0 : i32
    %c0_i32_0 = arith.constant 0 : i32
    %c0_i32_1 = arith.constant 0 : i32
    return %c0_i32, %c0_i32_0 : i32, i32
  }
  func.func @transform_3(%arg0: i32) -> (i32, i32) {
    %c0_i32 = arith.constant 0 : i32
    %c0_i32_0 = arith.constant 0 : i32
    %c0_i32_1 = arith.constant 0 : i32
    return %c0_i32, %c0_i32_0 : i32, i32
  }
  func.func @transform_4(%arg0: i32) -> (i32, i32) {
    %c0_i32 = arith.constant 0 : i32
    %c0_i32_0 = arith.constant 0 : i32
    %c0_i32_1 = arith.constant 0 : i32
    return %c0_i32, %c0_i32_0 : i32, i32
  }
  func.func @transform_5(%arg0: i32) -> (i32, i32) {
    %c0_i32 = arith.constant 0 : i32
    %c0_i32_0 = arith.constant 0 : i32
    %c0_i32_1 = arith.constant 0 : i32
    return %c0_i32, %c0_i32_0 : i32, i32
  }
  func.func @transform_6(%arg0: i32) -> (i32, i32) {
    %c0_i32 = arith.constant 0 : i32
    %c0_i32_0 = arith.constant 0 : i32
    %c0_i32_1 = arith.constant 0 : i32
    return %c0_i32, %c0_i32_0 : i32, i32
  }
  func.func @transform_7(%arg0: i32) -> (i32, i32) {
    %c0_i32 = arith.constant 0 : i32
    %c0_i32_0 = arith.constant 0 : i32
    %c0_i32_1 = arith.constant 0 : i32
    return %c0_i32, %c0_i32_0 : i32, i32
  }
  func.func @transform_8(%arg0: i32) -> (i32, i32) {
    %c0_i32 = arith.constant 0 : i32
    %c0_i32_0 = arith.constant 0 : i32
    %c0_i32_1 = arith.constant 0 : i32
    return %c0_i32, %c0_i32_0 : i32, i32
  }
  func.func @transform_9(%arg0: i32) -> (i32, i32) {
    %c0_i32 = arith.constant 0 : i32
    %c0_i32_0 = arith.constant 0 : i32
    return %arg0, %c0_i32 : i32, i32
  }
}

</mosaic_0001>

<bundles_post_ra>
// kernel: tpu_custom_call.1
= control target key start
LH: loop header
LB: loop body
LE: loop exit
PB: predicated region body
PF: predicated region fallthrough
CT: control target
= control target key end

     0   :  { %14 = vsyncpa [#allocation3], 0  ;;  %s580_s12 = smov [#allocation2]   ;;  %s581_s14 = smov 64   ;;  %s711_s0 = inlined_call_operand.vmem [shape: f32[16,32], index: 0, kind: input, shape index: {}]   ;;  %s712_s1 = inlined_call_operand.vmem [shape: bf16[32,256], index: 1, kind: input, shape index: {}]   ;;  %s713_s2 = inlined_call_operand.vmem [shape: f32[1,256], index: 2, kind: input, shape index: {}]   ;;  %s714_s3 = inlined_call_operand.hbm [shape: bf16[256,128], index: 3, kind: input, shape index: {}]   ;;  %s715_s4 = inlined_call_operand.vmem [shape: f32[1,128], index: 4, kind: input, shape index: {}]   ;;  %s716_s5 = inlined_call_operand.vmem [shape: bf16[128,64], index: 5, kind: input, shape index: {}]   ;;  %s717_s6 = inlined_call_operand.vmem [shape: f32[1,64], index: 6, kind: input, shape index: {}]   ;;  %s718_s7 = inlined_call_operand.vmem [shape: f32[2,64], index: 7, kind: input, shape index: {}]   ;;  %s719_s8 = inlined_call_operand.vmem [shape: f32[1,2], index: 8, kind: input, shape index: {}]   ;;  %s720_s9 = inlined_call_operand.vmem [shape: f32[16,2], index: 9, kind: output, shape index: {}]  }
   0x1   :  { %s25_s11 = sshll.u32 %s714_s3, 4  ;;  %s27_s13 = sshll.u32 %s580_s12, 4  ;;  %s26_s11 = int_to_ptr.hbm [resolvable:$true] %s25_s11  ;;  %s28_s13 = int_to_ptr.vmem [resolvable:$true] %s27_s13 }
   0x2   :  { %s582_s15 = smov 4  }
   0x3   :  { %33 = dma.hbm_to_vmem [thread:$0]  %s26_s11, 2048, %s28_s13, [#allocation3], %s581_s14, %s581_s14, %s582_s15  }
   0x4   :  { %578 = dma.done.wait [#allocation3], 2048  }
   0x5   :  { %579 = vsyncadd [#allocation3], 4294965248  ;;  %v416_v0 = vld [vmem:[%s712_s1 + $0x10] sm:$0xf]  ;;  %v523_v1 = vld [vmem:[%s712_s1 + $0x14] sm:$0xf0] }
   0x6   :  { %v408_v2 = vld [vmem:[%s712_s1] sm:$0xf]  ;;  %v417_v3 = vor.u32 %v523_v1, %v416_v0  ;;  %v521_v4 = vld [vmem:[%s712_s1 + $0x4] sm:$0xf0]  ;;  %v522_v5 = vld [vmem:[%s712_s1 + $0x14] sm:$0xf] }
   0x7   :  { %v418_v6 = vld [vmem:[%s712_s1 + $0x18] sm:$0xf0]  ;;  %v409_v7 = vor.u32 %v521_v4, %v408_v2  ;;  %v49_v8 = vld [vmem:[%s711_s0] sm:$0xff]  ;;  %v50_v9 = vld [vmem:[%s711_s0 + $0x8] sm:$0xff]  ;;  %vm82_vm0 = vcmask 261120   ;;  %vm371_vm1 = vcmask 523264  }
   0x8   :  { %92 = vmatpush.bf16.msra.mxu1 %v417_v3  ;;  %v531_v10 = vld [vmem:[#allocation2 + $0x38] sm:$0xff]  ;;  %v421_v11 = vor.u32 %v522_v5, %v418_v6  ;;  %v520_v12 = vld [vmem:[%s712_s1 + $0x4] sm:$0xf]  ;;  %v410_v13 = vld [vmem:[%s712_s1 + $0x8] sm:$0xf0]  ;;  %v51_v15 = vpack.c.bf16 %v50_v9, %v49_v8  ;;  %vm398_vm3 = vcmask 15360  }
   0x9   :  { %252 = vmatpush.bf16.msra.mxu2 %v531_v10  ;;  %v530_v14 = vld [vmem:[#allocation2 + $0x30] sm:$0xff]  ;;  %v413_v16 = vor.u32 %v520_v12, %v410_v13  ;;  %v529_v17 = vld [vmem:[#allocation2 + $0x28] sm:$0xff]  ;;  %v528_v18 = vld [vmem:[#allocation2 + $0x20] sm:$0xff] }
   0xa   :  { %v527_v19 = vld [vmem:[#allocation2 + $0x18] sm:$0xff]  ;;  %v526_v21 = vld [vmem:[#allocation2 + $0x10] sm:$0xff]  ;;  %v525_v23 = vld [vmem:[#allocation2 + $0x8] sm:$0xff] }
   0xb   :  { %v539_v20 = vld [vmem:[#allocation2 + $0x78] sm:$0xff]  ;;  %v538_v22 = vld [vmem:[#allocation2 + $0x70] sm:$0xff]  ;;  %v537_v24 = vld [vmem:[#allocation2 + $0x68] sm:$0xff] }
   0xc   :  { %93 = vmatpush.bf16.msra.mxu1 %v409_v7  ;;  %266 = vmatpush.bf16.msra.mxu3 %v539_v20  ;;  %v524_v25 = vld [vmem:[#allocation2] sm:$0xff]  ;;  %v535_v27 = vld [vmem:[#allocation2 + $0x58] sm:$0xff]  ;;  %v534_v28 = vld [vmem:[#allocation2 + $0x50] sm:$0xff] }
   0xd   :  { %253 = vmatpush.bf16.msra.mxu2 %v530_v14  ;;  %v536_v26 = vld [vmem:[#allocation2 + $0x60] sm:$0xff]  ;;  %v533_v29 = vld [vmem:[#allocation2 + $0x48] sm:$0xff]  ;;  %v547_v48 = vld [vmem:[%s716_s5 + $0x38] sm:$0xff] }
   0xe   :  { %v532_v30 = vld [vmem:[#allocation2 + $0x40] sm:$0xff]  ;;  %351 = vmatpush.bf16.msra.mxu0 %v547_v48  ;;  %v546_v49 = vld [vmem:[%s716_s5 + $0x30] sm:$0xff]  ;;  %v545_v50 = vld [vmem:[%s716_s5 + $0x28] sm:$0xff] }
   0xf   :  { %422 = vmatmul.msk.bf16.vlgmr.msra.gmra.mxu1 %vm82_vm0, %v51_v15  ;;  %v56_v31 = vld [vmem:[%s713_s2] sm:$0x3]  ;;  %v543_v52 = vld [vmem:[%s716_s5 + $0x18] sm:$0xff]  ;;  %v542_v53 = vld [vmem:[%s716_s5 + $0x10] sm:$0xff] }
  0x10   :  { %106 = vmatpush.bf16.msrb.mxu1 %v421_v11  ;;  %267 = vmatpush.bf16.msra.mxu3 %v538_v22  ;;  %v58_v33 = vperm.slane %v56_v31, 0  ;;  %v59_v41 = vperm.slane %v56_v31, 1  ;;  %v544_v51 = vld [vmem:[%s716_s5 + $0x20] sm:$0xff]  ;;  %v541_v54 = vld [vmem:[%s716_s5 + $0x8] sm:$0xff]  ;;  %v387_v22 = vlaneseq }
  0x11   :  { %254 = vmatpush.bf16.msra.mxu2 %v529_v17  ;;  %v540_v55 = vld [vmem:[%s716_s5] sm:$0xff] }
  0x12   :  { %352 = vmatpush.bf16.msra.mxu0 %v546_v49  ;;  %v551_v58 = vld [vmem:[%s715_s4] ss:$0 sm:$0xff] }
  0x13   :  { %v552_v4 = vld [vmem:[%s717_s6] ss:$0 sm:$0xff] }
  0x14   :  { %107 = vmatpush.bf16.msrb.mxu1 %v413_v16  ;;  %268 = vmatpush.bf16.msra.mxu3 %v537_v24  ;;  %v367_v5 = vld [vmem:[%s718_s7] sm:$0x3] }
  0x15   :  { %255 = vmatpush.bf16.msra.mxu2 %v528_v18  ;;  %v378_v8 = vperm.slane %v367_v5, 1  ;;  %v368_v9 = vperm.slane %v367_v5, 0  ;;  %v553_v24 = vld [vmem:[%s719_s8] ss:$0 sm:$0xff] }
  0x16   :  { %353 = vmatpush.bf16.msra.mxu0 %v545_v50 }
  0x18   :  { %269 = vmatpush.bf16.msra.mxu3 %v536_v26 }
  0x19   :  { %256 = vmatpush.bf16.msra.mxu2 %v527_v19 }
  0x1a   :  { %354 = vmatpush.bf16.msra.mxu0 %v544_v51 }
  0x1c   :  { %270 = vmatpush.bf16.msra.mxu3 %v535_v27 }
  0x1d   :  { %257 = vmatpush.bf16.msra.mxu2 %v526_v21 }
  0x1e   :  { %355 = vmatpush.bf16.msra.mxu0 %v543_v52 }
  0x1f   :  { %423 = vmatmul.msk.bf16.vlgmr.msrb.gmra.mxu1 %vm82_vm0, %v51_v15 }
  0x20   :  { %271 = vmatpush.bf16.msra.mxu3 %v534_v28 }
  0x21   :  { %258 = vmatpush.bf16.msra.mxu2 %v525_v23  ;;  %v388_v23 = vand.u32 127, %v387_v22 }
  0x22   :  { %356 = vmatpush.bf16.msra.mxu0 %v542_v53 }
  0x23   :  { %vm389_vm2 = vcmp.eq.s32.totalorder %v388_v23, 0 }
  0x24   :  { %272 = vmatpush.bf16.msra.mxu3 %v533_v29 }
  0x25   :  { %259 = vmatpush.bf16.msra.mxu2 %v524_v25 }
  0x26   :  { %357 = vmatpush.bf16.msra.mxu0 %v541_v54 }
  0x28   :  { %273 = vmatpush.bf16.msra.mxu3 %v532_v30 }
  0x2a   :  { %358 = vmatpush.bf16.msra.mxu0 %v540_v55 }
  0x8c   :  { %v95_v32 = vpop.f32.mrf.mxu1 }
  0x8d   :  { %v96_v34 = vadd.f32 %v95_v32, %v58_v33 }
  0x8f   :  { %v114_v37 = vmax.f32 %v96_v34, 0.0 }
  0x94   :  { %v97_v35 = vpop.f32.mrf.mxu1 }
  0x95   :  { %v98_v36 = vadd.f32 %v97_v35, %v58_v33 }
  0x97   :  { %v116_v38 = vmax.f32 %v98_v36, 0.0 }
  0x99   :  { %v118_v39 = vpack.c.bf16 %v116_v38, %v114_v37 }
  0x9b   :  { %260 = vmatmul.bf16.vlgmr.msra.gmra.mxu2 %v118_v39 }
  0x9c   :  { %v109_v40 = vpop.f32.mrf.mxu1 }
  0x9d   :  { %v110_v42 = vadd.f32 %v109_v40, %v59_v41 }
  0x9f   :  { %v115_v45 = vmax.f32 %v110_v42, 0.0 }
  0xa4   :  { %v111_v43 = vpop.f32.mrf.mxu1 }
  0xa5   :  { %v112_v44 = vadd.f32 %v111_v43, %v59_v41 }
  0xa7   :  { %v117_v46 = vmax.f32 %v112_v44, 0.0 }
  0xa9   :  { %v119_v47 = vpack.c.bf16 %v117_v46, %v115_v45 }
  0xab   :  { %274 = vmatmul.bf16.vlgmr.msra.gmra.mxu3 %v119_v47 }
 0x11e   :  { %v261_v56 = vpop.f32.mrf.mxu2 }
 0x11f   :  { %v262_v60 = vadd.f32 %v551_v58, %v261_v56 }
 0x126   :  { %v263_v59 = vpop.f32.mrf.mxu2 }
 0x127   :  { %v264_v61 = vadd.f32 %v551_v58, %v263_v59 }
 0x12e   :  { %v275_v57 = vpop.f32.mrf.mxu3 }
 0x12f   :  { %v276_v62 = vadd.f32 %v275_v57, %v262_v60 }
 0x131   :  { %v280_v1 = vmax.f32 %v276_v62, 0.0 }
 0x136   :  { %v277_v63 = vpop.f32.mrf.mxu3 }
 0x137   :  { %v278_v0 = vadd.f32 %v277_v63, %v264_v61 }
 0x139   :  { %v281_v2 = vmax.f32 %v278_v0, 0.0 }
 0x13b   :  { %v282_v3 = vpack.c.bf16 %v281_v2, %v280_v1 }
 0x13d   :  { %359 = vmatmul.bf16.vlgmr.msra.gmra.mxu0 %v282_v3 }
 0x1ba   :  { %v360_v6 = vpop.f32.mrf.mxu0 }
 0x1bb   :  { %v361_v7 = vadd.f32 %v552_v4, %v360_v6 }
 0x1bd   :  { %v365_v10 = vmax.f32 %v361_v7, 0.0 }
 0x1bf   :  { %v379_v11 = vmul.f32 %v378_v8, %v365_v10  ;;  %v369_v12 = vmul.f32 %v368_v9, %v365_v10 }
 0x1c1   :  { %v381_v13 = vsel %vm371_vm1, %v379_v11, 0.0  ;;  %v372_v14 = vsel %vm371_vm1, %v369_v12, 0.0 }
 0x1c2   :  { %v362_v15 = vpop.f32.mrf.mxu0  ;;  %382 = vadd.xlane.f32.xlu1 %v381_v13  ;;  %373 = vadd.xlane.f32.xlu0 %v372_v14 }
 0x1c3   :  { %v363_v16 = vadd.f32 %v552_v4, %v362_v15 }
 0x1c5   :  { %v366_v17 = vmax.f32 %v363_v16, 0.0 }
 0x1c7   :  { %v380_v18 = vmul.f32 %v378_v8, %v366_v17  ;;  %v370_v19 = vmul.f32 %v368_v9, %v366_v17 }
 0x1c9   :  { %v384_v20 = vsel %vm371_vm1, %v380_v18, 0.0  ;;  %v375_v21 = vsel %vm371_vm1, %v370_v19, 0.0 }
 0x1ca   :  { %385 = vadd.xlane.f32.xlu1 %v384_v20  ;;  %376 = vadd.xlane.f32.xlu0 %v375_v21 }
 0x235   :  { %v383_v25 = vpop.xlane.xlu1 %382  ;;  %v374_v26 = vpop.xlane.xlu0 %373 }
 0x236   :  { %v390_v27 = vsel %vm389_vm2, %v374_v26, %v383_v25 }
 0x237   :  { %v396_v28 = vadd.f32 %v553_v24, %v390_v27 }
 0x239   :  { %399 = vst.msk [vmem:[%s720_s9] sm:$0xff] %vm398_vm3, %v396_v28 }
 0x23d   :  { %v386_v29 = vpop.xlane.xlu1 %385  ;;  %v377_v30 = vpop.xlane.xlu0 %376 }
 0x23e   :  { %v391_v31 = vsel %vm389_vm2, %v377_v30, %v386_v29 }
 0x23f   :  { %v397_v32 = vadd.f32 %v553_v24, %v391_v31 }
 0x241   :  { %400 = vst.msk [vmem:[%s720_s9 + $0x8] sm:$0xff] %vm398_vm3, %v397_v32 }
 0x242   :  { %405 = vsyncpa [#allocation3], 1 }

</bundles_post_ra>
